<compile_context>
chip_gen: v6e
topology: v6e:2x2x1
jax: 0.10.0
libtpu: 0.0.40
codegen_flags: <defaults>
</compile_context>

<pallas_src>
import math
import jax
import jax.numpy as jnp
from jax.experimental import pallas as pl
from jax.experimental.pallas import tpu as pltpu

HIDDEN = 32
NUM_HEADS = 4
HEAD = HIDDEN // NUM_HEADS
LN_EPS = 1e-12


def crossatt_kernel(x_ref, c_ref, w_ref, vec_ref, out_ref):
    TB = x_ref.shape[0]
    Sq = x_ref.shape[1] // HIDDEN
    Sk = c_ref.shape[1] // HIDDEN
    H, NH, HD = HIDDEN, NUM_HEADS, HEAD

    # bf16 slabs -> f32 working copies (all in-kernel math is f32; v5e-safe).
    x_slab = x_ref[...].astype(jnp.float32)           # [TB, Sq*H]
    c_slab = c_ref[...].astype(jnp.float32)           # [TB, Sk*H]
    w = w_ref[...].astype(jnp.float32)                 # [H, 4H] = wq | wk | wv | wo
    vec = vec_ref[...]                                  # [2, 4H] f32

    bq = vec[0:1, 0:H]                 # attention scale already folded in
    bkv = vec[0:1, H:3 * H]
    bo = vec[0:1, 3 * H:4 * H]
    gamma = vec[1:2, 0:H]
    beta = vec[1:2, H:2 * H]

    # Lane-dense [TB, S*H] slab -> row form [TB*S, H] via static lane slices
    # (explicit relayout; all ops are plain slices / leading-dim reshapes).
    x3 = jnp.stack([x_slab[:, s * H:(s + 1) * H] for s in range(Sq)], axis=1)  # [TB,Sq,H]
    c3 = jnp.stack([c_slab[:, s * H:(s + 1) * H] for s in range(Sk)], axis=1)  # [TB,Sk,H]
    x2 = x3.reshape(TB * Sq, H)
    c2 = c3.reshape(TB * Sk, H)

    # Projections on the MXU: Q and fused K|V.  1/sqrt(dh) folded into wq/bq.
    q2 = jnp.dot(x2, w[:, 0:H], preferred_element_type=jnp.float32) + bq        # [TB*Sq, H]
    kv2 = jnp.dot(c2, w[:, H:3 * H], preferred_element_type=jnp.float32) + bkv  # [TB*Sk, 2H]
    q3 = q2.reshape(TB, Sq, H)
    kv3 = kv2.reshape(TB, Sk, 2 * H)

    # Stack heads along the (leading) batch axis -> a single batched einsum pair
    # and a single softmax cover all heads.
    qh = jnp.concatenate([q3[:, :, h * HD:(h + 1) * HD] for h in range(NH)], axis=0)        # [NH*TB,Sq,HD]
    kh = jnp.concatenate([kv3[:, :, h * HD:(h + 1) * HD] for h in range(NH)], axis=0)       # [NH*TB,Sk,HD]
    vh = jnp.concatenate([kv3[:, :, H + h * HD:H + (h + 1) * HD] for h in range(NH)], axis=0)

    s = jnp.einsum('bqd,bkd->bqk', qh, kh, preferred_element_type=jnp.float32)  # [NH*TB,Sq,Sk]
    s = s - jnp.max(s, axis=-1, keepdims=True)
    p = jnp.exp(s)
    # TODO(synk): attention-probs dropout omitted (eval mode / identity).
    p = p * pl.reciprocal(jnp.sum(p, axis=-1, keepdims=True), approx=True)
    ch = jnp.einsum('bqk,bkd->bqd', p, vh, preferred_element_type=jnp.float32)  # [NH*TB,Sq,HD]

    # Un-stack heads (== torch permute(0,2,1,3) + reshape).
    ctx3 = jnp.concatenate([ch[h * TB:(h + 1) * TB] for h in range(NH)], axis=-1)  # [TB,Sq,H]
    ctx2 = ctx3.reshape(TB * Sq, H)

    # Output dense + (hidden dropout = identity) + residual + LayerNorm (f32 math).
    o = jnp.dot(ctx2, w[:, 3 * H:4 * H], preferred_element_type=jnp.float32) + bo
    o = o + x2
    mean = jnp.mean(o, axis=-1, keepdims=True)
    var = jnp.mean((o - mean) ** 2, axis=-1, keepdims=True)
    y = (o - mean) * jax.lax.rsqrt(var + LN_EPS) * gamma + beta                  # [TB*Sq, H]

    # Row form -> lane-dense [TB, Sq*H] slab so the writeback store/DMA is dense.
    y3 = y.reshape(TB, Sq, H)
    out_slab = jnp.concatenate([y3[:, s2, :] for s2 in range(Sq)], axis=-1)      # [TB, Sq*H]
    out_ref[...] = out_slab.astype(out_ref.dtype)


def bert_crossatt_layer(x, ctx, params, *, block_b=None):
    B, Sq, H = x.shape
    _, Sk, _ = ctx.shape
    assert H == HIDDEN

    # Fold the attention scale into the query projection (constant weights -> free).
    scale = 1.0 / math.sqrt(HEAD)

    # Parameter slabs: one lane-dense [32,128] bf16 weight slab and one [2,128] f32
    # bias/LayerNorm slab  ->  2 DMA descriptors instead of 10 tiny ones.
    w_slab = jnp.concatenate(
        [params["wq"] * scale, params["wk"], params["wv"], params["wo"]],
        axis=1).astype(jnp.bfloat16)                                           # [32, 128]
    vec_slab = jnp.concatenate([
        jnp.concatenate([params["bq"] * scale, params["bk"],
                         params["bv"], params["bo"]], axis=1),
        jnp.concatenate([params["gamma"], params["beta"],
                         jnp.zeros((1, 2 * HIDDEN), jnp.float32)], axis=1),
    ], axis=0).astype(jnp.float32)                                             # [2, 128]

    # Lane-dense activation slabs; bf16 halves HBM traffic (compute stays f32 in-kernel).
    x_slab = x.reshape(B, Sq * H).astype(jnp.bfloat16)
    c_slab = ctx.reshape(B, Sk * H).astype(jnp.bfloat16)

    # Batch block: ~1024 query rows per grid step; keep >=2 "parallel" steps when the
    # batch is big enough so both v7x TensorCores get work; sublane-align partial blocks.
    if block_b is None:
        block_b = min(B, max(1, pl.cdiv(1024, Sq)))
        if block_b == B and (B // 2) * Sq >= 512:
            block_b = pl.cdiv(B, 2)
    if block_b < B and block_b % 8 != 0:
        block_b = max(8, (block_b // 8) * 8)
    block_b = min(block_b, B)
    grid_b = pl.cdiv(B, block_b)

    in_specs = [
        pl.BlockSpec((block_b, Sq * H), lambda b: (b, 0)),
        pl.BlockSpec((block_b, Sk * H), lambda b: (b, 0)),
        pl.BlockSpec((HIDDEN, 4 * HIDDEN), lambda b: (0, 0)),
        pl.BlockSpec((2, 4 * HIDDEN), lambda b: (0, 0)),
    ]
    out_spec = pl.BlockSpec((block_b, Sq * H), lambda b: (b, 0))

    # Advisory cost estimate for XLA's scheduler around this small custom call.
    flops = (2 * B * Sq * H * H                       # Q projection
             + 2 * B * Sk * H * 2 * H                 # fused K|V projection
             + 4 * B * NUM_HEADS * Sq * Sk * HEAD     # scores + probs @ V
             + 2 * B * Sq * H * H)                    # output dense
    bytes_accessed = (2 * (int(x_slab.size) + int(c_slab.size))   # bf16 inputs
                      + 2 * int(w_slab.size) + 4 * int(vec_slab.size)
                      + 4 * B * Sq * H)                            # f32 output
    cost = pl.CostEstimate(flops=flops,
                           transcendentals=B * NUM_HEADS * Sq * Sk,
                           bytes_accessed=int(bytes_accessed))

    out_slab = pl.pallas_call(
        crossatt_kernel,
        out_shape=jax.ShapeDtypeStruct((B, Sq * H), jnp.float32),
        grid_spec=pltpu.PrefetchScalarGridSpec(
            num_scalar_prefetch=0,
            grid=(grid_b,),
            in_specs=in_specs,
            out_specs=out_spec,
        ),
        compiler_params=pltpu.CompilerParams(dimension_semantics=("parallel",)),
        cost_estimate=cost,
    )(x_slab, c_slab, w_slab, vec_slab)
    return out_slab.reshape(B, Sq, H)


def init_params(key, hidden=HIDDEN):
    keys = jax.random.split(key, 8)
    s = 0.02
    return {
        "wq": s * jax.random.normal(keys[0], (hidden, hidden), jnp.float32),
        "bq": s * jax.random.normal(keys[1], (1, hidden), jnp.float32),
        "wk": s * jax.random.normal(keys[2], (hidden, hidden), jnp.float32),
        "bk": s * jax.random.normal(keys[3], (1, hidden), jnp.float32),
        "wv": s * jax.random.normal(keys[4], (hidden, hidden), jnp.float32),
        "bv": s * jax.random.normal(keys[5], (1, hidden), jnp.float32),
        "wo": s * jax.random.normal(keys[6], (hidden, hidden), jnp.float32),
        "bo": s * jax.random.normal(keys[7], (1, hidden), jnp.float32),
        "gamma": jnp.ones((1, hidden), jnp.float32),
        "beta": jnp.zeros((1, hidden), jnp.float32),
    }


if __name__ == "__main__":
    key = jax.random.PRNGKey(0)
    k_x, k_c, k_p = jax.random.split(key, 3)

    B, Sq, Sk = 2, 8, 8
    x = jax.random.normal(k_x, (B, Sq, HIDDEN), jnp.float32)      # input_tensor
    ctx = jax.random.normal(k_c, (B, Sk, HIDDEN), jnp.float32)    # ctx_tensor
    params = init_params(k_p)

    out = bert_crossatt_layer(x, ctx, params)
    jax.block_until_ready(out)
    assert out.shape == (B, Sq, HIDDEN)
    print("KERNEL_OK")
</pallas_src>

<mosaic_0001>
module attributes {stable_mosaic.version = 11 : i64} {
  func.func @crossatt_kernel(%arg0: i32, %arg1: memref<2x256xbf16, #tpu.memory_space<vmem>>, %arg2: memref<2x256xbf16, #tpu.memory_space<vmem>>, %arg3: memref<32x128xbf16, #tpu.memory_space<vmem>>, %arg4: memref<2x128xf32, #tpu.memory_space<vmem>>, %arg5: memref<2x256xf32, #tpu.memory_space<vmem>>) attributes {dimension_semantics = [#tpu.dimension_semantics<parallel>], iteration_bounds = array<i64: 1>, scalar_prefetch = 0 : i64, scratch_operands = 0 : i64, tpu.core_type = #tpu.core_type<tc>, window_params = [{transform_indices = @transform_0, window_bounds = array<i64: 2, 256>}, {transform_indices = @transform_1, window_bounds = array<i64: 2, 256>}, {pipeline_mode = #tpu.pipeline_mode<synchronous>, transform_indices = @transform_2, window_bounds = array<i64: 32, 128>}, {pipeline_mode = #tpu.pipeline_mode<synchronous>, transform_indices = @transform_3, window_bounds = array<i64: 2, 128>}, {transform_indices = @transform_4, window_bounds = array<i64: 2, 256>}]} {
    %c0 = arith.constant 0 : index
    %c0_0 = arith.constant 0 : index
    %0 = vector.load %arg1[%c0, %c0_0] : memref<2x256xbf16, #tpu.memory_space<vmem>>, vector<2x256xbf16>
    %1 = arith.extf %0 : vector<2x256xbf16> to vector<2x256xf32>
    %c0_1 = arith.constant 0 : index
    %c0_2 = arith.constant 0 : index
    %2 = vector.load %arg2[%c0_1, %c0_2] : memref<2x256xbf16, #tpu.memory_space<vmem>>, vector<2x256xbf16>
    %3 = arith.extf %2 : vector<2x256xbf16> to vector<2x256xf32>
    %c0_3 = arith.constant 0 : index
    %c0_4 = arith.constant 0 : index
    %4 = vector.load %arg3[%c0_3, %c0_4] : memref<32x128xbf16, #tpu.memory_space<vmem>>, vector<32x128xbf16>
    %5 = arith.extf %4 : vector<32x128xbf16> to vector<32x128xf32>
    %c0_5 = arith.constant 0 : index
    %c0_6 = arith.constant 0 : index
    %6 = vector.load %arg4[%c0_5, %c0_6] : memref<2x128xf32, #tpu.memory_space<vmem>>, vector<2x128xf32>
    %7 = vector.extract_strided_slice %6 {offsets = [0, 0], sizes = [1, 32], strides = [1, 1]} : vector<2x128xf32> to vector<1x32xf32>
    %8 = vector.extract_strided_slice %6 {offsets = [0, 32], sizes = [1, 64], strides = [1, 1]} : vector<2x128xf32> to vector<1x64xf32>
    %9 = vector.extract_strided_slice %6 {offsets = [0, 96], sizes = [1, 32], strides = [1, 1]} : vector<2x128xf32> to vector<1x32xf32>
    %10 = vector.extract_strided_slice %6 {offsets = [1, 0], sizes = [1, 32], strides = [1, 1]} : vector<2x128xf32> to vector<1x32xf32>
    %11 = vector.extract_strided_slice %6 {offsets = [1, 32], sizes = [1, 32], strides = [1, 1]} : vector<2x128xf32> to vector<1x32xf32>
    %12 = vector.extract_strided_slice %1 {offsets = [0, 0], sizes = [2, 32], strides = [1, 1]} : vector<2x256xf32> to vector<2x32xf32>
    %13 = vector.extract_strided_slice %1 {offsets = [0, 32], sizes = [2, 32], strides = [1, 1]} : vector<2x256xf32> to vector<2x32xf32>
    %14 = vector.extract_strided_slice %1 {offsets = [0, 64], sizes = [2, 32], strides = [1, 1]} : vector<2x256xf32> to vector<2x32xf32>
    %15 = vector.extract_strided_slice %1 {offsets = [0, 96], sizes = [2, 32], strides = [1, 1]} : vector<2x256xf32> to vector<2x32xf32>
    %16 = vector.extract_strided_slice %1 {offsets = [0, 128], sizes = [2, 32], strides = [1, 1]} : vector<2x256xf32> to vector<2x32xf32>
    %17 = vector.extract_strided_slice %1 {offsets = [0, 160], sizes = [2, 32], strides = [1, 1]} : vector<2x256xf32> to vector<2x32xf32>
    %18 = vector.extract_strided_slice %1 {offsets = [0, 192], sizes = [2, 32], strides = [1, 1]} : vector<2x256xf32> to vector<2x32xf32>
    %19 = vector.extract_strided_slice %1 {offsets = [0, 224], sizes = [2, 32], strides = [1, 1]} : vector<2x256xf32> to vector<2x32xf32>
    %20 = vector.shape_cast %12 : vector<2x32xf32> to vector<2x1x32xf32>
    %21 = vector.shape_cast %13 : vector<2x32xf32> to vector<2x1x32xf32>
    %22 = vector.shape_cast %14 : vector<2x32xf32> to vector<2x1x32xf32>
    %23 = vector.shape_cast %15 : vector<2x32xf32> to vector<2x1x32xf32>
    %24 = vector.shape_cast %16 : vector<2x32xf32> to vector<2x1x32xf32>
    %25 = vector.shape_cast %17 : vector<2x32xf32> to vector<2x1x32xf32>
    %26 = vector.shape_cast %18 : vector<2x32xf32> to vector<2x1x32xf32>
    %27 = vector.shape_cast %19 : vector<2x32xf32> to vector<2x1x32xf32>
    %28 = tpu.concatenate %20, %21, %22, %23, %24, %25, %26, %27 in 1 : vector<2x1x32xf32>, vector<2x1x32xf32>, vector<2x1x32xf32>, vector<2x1x32xf32>, vector<2x1x32xf32>, vector<2x1x32xf32>, vector<2x1x32xf32>, vector<2x1x32xf32> -> vector<2x8x32xf32>
    %29 = vector.extract_strided_slice %3 {offsets = [0, 0], sizes = [2, 32], strides = [1, 1]} : vector<2x256xf32> to vector<2x32xf32>
    %30 = vector.extract_strided_slice %3 {offsets = [0, 32], sizes = [2, 32], strides = [1, 1]} : vector<2x256xf32> to vector<2x32xf32>
    %31 = vector.extract_strided_slice %3 {offsets = [0, 64], sizes = [2, 32], strides = [1, 1]} : vector<2x256xf32> to vector<2x32xf32>
    %32 = vector.extract_strided_slice %3 {offsets = [0, 96], sizes = [2, 32], strides = [1, 1]} : vector<2x256xf32> to vector<2x32xf32>
    %33 = vector.extract_strided_slice %3 {offsets = [0, 128], sizes = [2, 32], strides = [1, 1]} : vector<2x256xf32> to vector<2x32xf32>
    %34 = vector.extract_strided_slice %3 {offsets = [0, 160], sizes = [2, 32], strides = [1, 1]} : vector<2x256xf32> to vector<2x32xf32>
    %35 = vector.extract_strided_slice %3 {offsets = [0, 192], sizes = [2, 32], strides = [1, 1]} : vector<2x256xf32> to vector<2x32xf32>
    %36 = vector.extract_strided_slice %3 {offsets = [0, 224], sizes = [2, 32], strides = [1, 1]} : vector<2x256xf32> to vector<2x32xf32>
    %37 = vector.shape_cast %29 : vector<2x32xf32> to vector<2x1x32xf32>
    %38 = vector.shape_cast %30 : vector<2x32xf32> to vector<2x1x32xf32>
    %39 = vector.shape_cast %31 : vector<2x32xf32> to vector<2x1x32xf32>
    %40 = vector.shape_cast %32 : vector<2x32xf32> to vector<2x1x32xf32>
    %41 = vector.shape_cast %33 : vector<2x32xf32> to vector<2x1x32xf32>
    %42 = vector.shape_cast %34 : vector<2x32xf32> to vector<2x1x32xf32>
    %43 = vector.shape_cast %35 : vector<2x32xf32> to vector<2x1x32xf32>
    %44 = vector.shape_cast %36 : vector<2x32xf32> to vector<2x1x32xf32>
    %45 = tpu.concatenate %37, %38, %39, %40, %41, %42, %43, %44 in 1 : vector<2x1x32xf32>, vector<2x1x32xf32>, vector<2x1x32xf32>, vector<2x1x32xf32>, vector<2x1x32xf32>, vector<2x1x32xf32>, vector<2x1x32xf32>, vector<2x1x32xf32> -> vector<2x8x32xf32>
    %46 = vector.shape_cast %28 : vector<2x8x32xf32> to vector<16x32xf32>
    %47 = vector.shape_cast %45 : vector<2x8x32xf32> to vector<16x32xf32>
    %48 = vector.extract_strided_slice %5 {offsets = [0, 0], sizes = [32, 32], strides = [1, 1]} : vector<32x128xf32> to vector<32x32xf32>
    %cst = arith.constant dense<0.000000e+00> : vector<16x32xf32>
    %49 = tpu.matmul %46, %48, %cst {dimension_numbers = #tpu.dot_dimension_numbers<[1], [0], [0], [1], [0, 0, 1, 1], [], []>} : vector<16x32xf32>, vector<32x32xf32>, vector<16x32xf32> -> vector<16x32xf32>
    %50 = vector.broadcast %7 : vector<1x32xf32> to vector<16x32xf32>
    %51 = arith.addf %49, %50 : vector<16x32xf32>
    %52 = vector.extract_strided_slice %5 {offsets = [0, 32], sizes = [32, 64], strides = [1, 1]} : vector<32x128xf32> to vector<32x64xf32>
    %cst_7 = arith.constant dense<0.000000e+00> : vector<16x64xf32>
    %53 = tpu.matmul %47, %52, %cst_7 {dimension_numbers = #tpu.dot_dimension_numbers<[1], [0], [0], [1], [0, 0, 1, 1], [], []>} : vector<16x32xf32>, vector<32x64xf32>, vector<16x64xf32> -> vector<16x64xf32>
    %54 = vector.broadcast %8 : vector<1x64xf32> to vector<16x64xf32>
    %55 = arith.addf %53, %54 : vector<16x64xf32>
    %56 = vector.shape_cast %51 : vector<16x32xf32> to vector<2x8x32xf32>
    %57 = vector.shape_cast %55 : vector<16x64xf32> to vector<2x8x64xf32>
    %58 = vector.extract_strided_slice %56 {offsets = [0, 0, 0], sizes = [2, 8, 8], strides = [1, 1, 1]} : vector<2x8x32xf32> to vector<2x8x8xf32>
    %59 = vector.extract_strided_slice %56 {offsets = [0, 0, 8], sizes = [2, 8, 8], strides = [1, 1, 1]} : vector<2x8x32xf32> to vector<2x8x8xf32>
    %60 = vector.extract_strided_slice %56 {offsets = [0, 0, 16], sizes = [2, 8, 8], strides = [1, 1, 1]} : vector<2x8x32xf32> to vector<2x8x8xf32>
    %61 = vector.extract_strided_slice %56 {offsets = [0, 0, 24], sizes = [2, 8, 8], strides = [1, 1, 1]} : vector<2x8x32xf32> to vector<2x8x8xf32>
    %62 = tpu.concatenate %58, %59, %60, %61 in 0 : vector<2x8x8xf32>, vector<2x8x8xf32>, vector<2x8x8xf32>, vector<2x8x8xf32> -> vector<8x8x8xf32>
    %63 = vector.extract_strided_slice %57 {offsets = [0, 0, 0], sizes = [2, 8, 8], strides = [1, 1, 1]} : vector<2x8x64xf32> to vector<2x8x8xf32>
    %64 = vector.extract_strided_slice %57 {offsets = [0, 0, 8], sizes = [2, 8, 8], strides = [1, 1, 1]} : vector<2x8x64xf32> to vector<2x8x8xf32>
    %65 = vector.extract_strided_slice %57 {offsets = [0, 0, 16], sizes = [2, 8, 8], strides = [1, 1, 1]} : vector<2x8x64xf32> to vector<2x8x8xf32>
    %66 = vector.extract_strided_slice %57 {offsets = [0, 0, 24], sizes = [2, 8, 8], strides = [1, 1, 1]} : vector<2x8x64xf32> to vector<2x8x8xf32>
    %67 = tpu.concatenate %63, %64, %65, %66 in 0 : vector<2x8x8xf32>, vector<2x8x8xf32>, vector<2x8x8xf32>, vector<2x8x8xf32> -> vector<8x8x8xf32>
    %68 = vector.extract_strided_slice %57 {offsets = [0, 0, 32], sizes = [2, 8, 8], strides = [1, 1, 1]} : vector<2x8x64xf32> to vector<2x8x8xf32>
    %69 = vector.extract_strided_slice %57 {offsets = [0, 0, 40], sizes = [2, 8, 8], strides = [1, 1, 1]} : vector<2x8x64xf32> to vector<2x8x8xf32>
    %70 = vector.extract_strided_slice %57 {offsets = [0, 0, 48], sizes = [2, 8, 8], strides = [1, 1, 1]} : vector<2x8x64xf32> to vector<2x8x8xf32>
    %71 = vector.extract_strided_slice %57 {offsets = [0, 0, 56], sizes = [2, 8, 8], strides = [1, 1, 1]} : vector<2x8x64xf32> to vector<2x8x8xf32>
    %72 = tpu.concatenate %68, %69, %70, %71 in 0 : vector<2x8x8xf32>, vector<2x8x8xf32>, vector<2x8x8xf32>, vector<2x8x8xf32> -> vector<8x8x8xf32>
    "tpu.trace_start"() <{level = 10 : i32, message = "bqd,bkd->bqk"}> : () -> ()
    %cst_8 = arith.constant dense<0.000000e+00> : vector<8x8x8xf32>
    %73 = tpu.matmul %62, %67, %cst_8 {dimension_numbers = #tpu.dot_dimension_numbers<[2], [2], [1], [1], [0, 0, 0, 1, 1, 1], [0], [0]>} : vector<8x8x8xf32>, vector<8x8x8xf32>, vector<8x8x8xf32> -> vector<8x8x8xf32>
    "tpu.trace_stop"() : () -> ()
    %cst_9 = arith.constant dense<0xFF800000> : vector<8x8xf32>
    %74 = vector.multi_reduction <maximumf>, %73, %cst_9 [2] : vector<8x8x8xf32> to vector<8x8xf32>
    %75 = vector.shape_cast %74 : vector<8x8xf32> to vector<8x8x1xf32>
    %76 = vector.broadcast %75 : vector<8x8x1xf32> to vector<8x8x8xf32>
    %77 = arith.subf %73, %76 : vector<8x8x8xf32>
    %78 = math.exp %77 : vector<8x8x8xf32>
    %cst_10 = arith.constant dense<0.000000e+00> : vector<8x8xf32>
    %79 = vector.multi_reduction <add>, %78, %cst_10 [2] : vector<8x8x8xf32> to vector<8x8xf32>
    %80 = vector.shape_cast %79 : vector<8x8xf32> to vector<8x8x1xf32>
    %81 = tpu.reciprocal %80 {approx = true} : vector<8x8x1xf32> -> vector<8x8x1xf32>
    %82 = vector.broadcast %81 : vector<8x8x1xf32> to vector<8x8x8xf32>
    %83 = arith.mulf %78, %82 : vector<8x8x8xf32>
    "tpu.trace_start"() <{level = 10 : i32, message = "bqk,bkd->bqd"}> : () -> ()
    %cst_11 = arith.constant dense<0.000000e+00> : vector<8x8x8xf32>
    %84 = tpu.matmul %83, %72, %cst_11 {dimension_numbers = #tpu.dot_dimension_numbers<[2], [1], [1], [2], [0, 0, 0, 1, 1, 2], [0], [0]>} : vector<8x8x8xf32>, vector<8x8x8xf32>, vector<8x8x8xf32> -> vector<8x8x8xf32>
    "tpu.trace_stop"() : () -> ()
    %85 = vector.extract_strided_slice %84 {offsets = [0, 0, 0], sizes = [2, 8, 8], strides = [1, 1, 1]} : vector<8x8x8xf32> to vector<2x8x8xf32>
    %86 = vector.extract_strided_slice %84 {offsets = [2, 0, 0], sizes = [2, 8, 8], strides = [1, 1, 1]} : vector<8x8x8xf32> to vector<2x8x8xf32>
    %87 = vector.extract_strided_slice %84 {offsets = [4, 0, 0], sizes = [2, 8, 8], strides = [1, 1, 1]} : vector<8x8x8xf32> to vector<2x8x8xf32>
    %88 = vector.extract_strided_slice %84 {offsets = [6, 0, 0], sizes = [2, 8, 8], strides = [1, 1, 1]} : vector<8x8x8xf32> to vector<2x8x8xf32>
    %89 = tpu.concatenate %85, %86, %87, %88 in 2 : vector<2x8x8xf32>, vector<2x8x8xf32>, vector<2x8x8xf32>, vector<2x8x8xf32> -> vector<2x8x32xf32>
    %90 = vector.shape_cast %89 : vector<2x8x32xf32> to vector<16x32xf32>
    %91 = vector.extract_strided_slice %5 {offsets = [0, 96], sizes = [32, 32], strides = [1, 1]} : vector<32x128xf32> to vector<32x32xf32>
    %cst_12 = arith.constant dense<0.000000e+00> : vector<16x32xf32>
    %92 = tpu.matmul %90, %91, %cst_12 {dimension_numbers = #tpu.dot_dimension_numbers<[1], [0], [0], [1], [0, 0, 1, 1], [], []>} : vector<16x32xf32>, vector<32x32xf32>, vector<16x32xf32> -> vector<16x32xf32>
    %93 = vector.broadcast %9 : vector<1x32xf32> to vector<16x32xf32>
    %94 = arith.addf %92, %93 : vector<16x32xf32>
    %95 = arith.addf %94, %46 : vector<16x32xf32>
    %cst_13 = arith.constant dense<0.000000e+00> : vector<16xf32>
    %96 = vector.multi_reduction <add>, %95, %cst_13 [1] : vector<16x32xf32> to vector<16xf32>
    %97 = vector.shape_cast %96 : vector<16xf32> to vector<16x1xf32>
    %cst_14 = arith.constant 3.200000e+01 : f32
    %98 = vector.broadcast %cst_14 : f32 to vector<16x1xf32>
    %99 = arith.divf %97, %98 : vector<16x1xf32>
    %100 = vector.broadcast %99 : vector<16x1xf32> to vector<16x32xf32>
    %101 = arith.subf %95, %100 : vector<16x32xf32>
    %102 = arith.mulf %101, %101 : vector<16x32xf32>
    %cst_15 = arith.constant dense<0.000000e+00> : vector<16xf32>
    %103 = vector.multi_reduction <add>, %102, %cst_15 [1] : vector<16x32xf32> to vector<16xf32>
    %104 = vector.shape_cast %103 : vector<16xf32> to vector<16x1xf32>
    %cst_16 = arith.constant 3.200000e+01 : f32
    %105 = vector.broadcast %cst_16 : f32 to vector<16x1xf32>
    %106 = arith.divf %104, %105 : vector<16x1xf32>
    %107 = vector.broadcast %99 : vector<16x1xf32> to vector<16x32xf32>
    %108 = arith.subf %95, %107 : vector<16x32xf32>
    %cst_17 = arith.constant 9.99999996E-13 : f32
    %109 = vector.broadcast %cst_17 : f32 to vector<16x1xf32>
    %110 = arith.addf %106, %109 : vector<16x1xf32>
    %111 = math.rsqrt %110 : vector<16x1xf32>
    %112 = vector.broadcast %111 : vector<16x1xf32> to vector<16x32xf32>
    %113 = arith.mulf %108, %112 : vector<16x32xf32>
    %114 = vector.broadcast %10 : vector<1x32xf32> to vector<16x32xf32>
    %115 = arith.mulf %113, %114 : vector<16x32xf32>
    %116 = vector.broadcast %11 : vector<1x32xf32> to vector<16x32xf32>
    %117 = arith.addf %115, %116 : vector<16x32xf32>
    %118 = vector.shape_cast %117 : vector<16x32xf32> to vector<2x8x32xf32>
    %119 = vector.extract_strided_slice %118 {offsets = [0, 0, 0], sizes = [2, 1, 32], strides = [1, 1, 1]} : vector<2x8x32xf32> to vector<2x1x32xf32>
    %120 = vector.shape_cast %119 : vector<2x1x32xf32> to vector<2x32xf32>
    %121 = vector.extract_strided_slice %118 {offsets = [0, 1, 0], sizes = [2, 1, 32], strides = [1, 1, 1]} : vector<2x8x32xf32> to vector<2x1x32xf32>
    %122 = vector.shape_cast %121 : vector<2x1x32xf32> to vector<2x32xf32>
    %123 = vector.extract_strided_slice %118 {offsets = [0, 2, 0], sizes = [2, 1, 32], strides = [1, 1, 1]} : vector<2x8x32xf32> to vector<2x1x32xf32>
    %124 = vector.shape_cast %123 : vector<2x1x32xf32> to vector<2x32xf32>
    %125 = vector.extract_strided_slice %118 {offsets = [0, 3, 0], sizes = [2, 1, 32], strides = [1, 1, 1]} : vector<2x8x32xf32> to vector<2x1x32xf32>
    %126 = vector.shape_cast %125 : vector<2x1x32xf32> to vector<2x32xf32>
    %127 = vector.extract_strided_slice %118 {offsets = [0, 4, 0], sizes = [2, 1, 32], strides = [1, 1, 1]} : vector<2x8x32xf32> to vector<2x1x32xf32>
    %128 = vector.shape_cast %127 : vector<2x1x32xf32> to vector<2x32xf32>
    %129 = vector.extract_strided_slice %118 {offsets = [0, 5, 0], sizes = [2, 1, 32], strides = [1, 1, 1]} : vector<2x8x32xf32> to vector<2x1x32xf32>
    %130 = vector.shape_cast %129 : vector<2x1x32xf32> to vector<2x32xf32>
    %131 = vector.extract_strided_slice %118 {offsets = [0, 6, 0], sizes = [2, 1, 32], strides = [1, 1, 1]} : vector<2x8x32xf32> to vector<2x1x32xf32>
    %132 = vector.shape_cast %131 : vector<2x1x32xf32> to vector<2x32xf32>
    %133 = vector.extract_strided_slice %118 {offsets = [0, 7, 0], sizes = [2, 1, 32], strides = [1, 1, 1]} : vector<2x8x32xf32> to vector<2x1x32xf32>
    %134 = vector.shape_cast %133 : vector<2x1x32xf32> to vector<2x32xf32>
    %135 = tpu.concatenate %120, %122, %124, %126, %128, %130, %132, %134 in 1 : vector<2x32xf32>, vector<2x32xf32>, vector<2x32xf32>, vector<2x32xf32>, vector<2x32xf32>, vector<2x32xf32>, vector<2x32xf32>, vector<2x32xf32> -> vector<2x256xf32>
    %c0_18 = arith.constant 0 : index
    %c0_19 = arith.constant 0 : index
    %136 = vector.load %arg5[%c0_18, %c0_19] : memref<2x256xf32, #tpu.memory_space<vmem>>, vector<2x256xf32>
    tpu.vector_store %arg5[%c0_18, %c0_19], %135 {strides = array<i32>} : memref<2x256xf32, #tpu.memory_space<vmem>>, vector<2x256xf32>,
    return
  }
  func.func @transform_0(%arg0: i32) -> (i32, i32) {
    %c0_i32 = arith.constant 0 : i32
    %c0_i32_0 = arith.constant 0 : i32
    return %arg0, %c0_i32 : i32, i32
  }
  func.func @transform_1(%arg0: i32) -> (i32, i32) {
    %c0_i32 = arith.constant 0 : i32
    %c0_i32_0 = arith.constant 0 : i32
    return %arg0, %c0_i32 : i32, i32
  }
  func.func @transform_2(%arg0: i32) -> (i32, i32) {
    %c0_i32 = arith.constant 0 : i32
    %c0_i32_0 = arith.constant 0 : i32
    %c0_i32_1 = arith.constant 0 : i32
    return %c0_i32, %c0_i32_0 : i32, i32
  }
  func.func @transform_3(%arg0: i32) -> (i32, i32) {
    %c0_i32 = arith.constant 0 : i32
    %c0_i32_0 = arith.constant 0 : i32
    %c0_i32_1 = arith.constant 0 : i32
    return %c0_i32, %c0_i32_0 : i32, i32
  }
  func.func @transform_4(%arg0: i32) -> (i32, i32) {
    %c0_i32 = arith.constant 0 : i32
    %c0_i32_0 = arith.constant 0 : i32
    return %arg0, %c0_i32 : i32, i32
  }
}

</mosaic_0001>

<bundles_post_ra>
// kernel: tpu_custom_call.1
= control target key start
LH: loop header
LB: loop body
LE: loop exit
PB: predicated region body
PF: predicated region fallthrough
CT: control target
= control target key end

     0   :  { %9 = vsyncpa [#allocation3], 0  ;;  %s2821_s0 = inlined_call_operand.hbm [shape: bf16[2,256], index: 0, kind: input, shape index: {}]   ;;  %s2822_s1 = inlined_call_operand.hbm [shape: bf16[2,256], index: 1, kind: input, shape index: {}]   ;;  %s2823_s2 = inlined_call_operand.hbm [shape: bf16[32,128], index: 2, kind: input, shape index: {}]   ;;  %s2824_s3 = inlined_call_operand.vmem [shape: f32[2,128], index: 3, kind: input, shape index: {}]   ;;  %s2825_s4 = inlined_call_operand.hbm [shape: f32[2,256], index: 4, kind: output, shape index: {}]  }
   0x1   :  { %10 = vsyncpa [#allocation6], 0 }
   0x2   :  { %11 = vsyncpa [#allocation4], 0  ;;  %s2438_s15 = smov [#allocation5]   ;;  %s2439_s17 = smov [#allocation2]  }
   0x3   :  { %s28_s16 = sshll.u32 %s2438_s15, 4  ;;  %s18_s18 = sshll.u32 %s2439_s17, 4  ;;  %s29_s16 = int_to_ptr.vmem [resolvable:$true] %s28_s16  ;;  %s19_s18 = int_to_ptr.vmem [resolvable:$true] %s18_s18 }
   0x4   :  { %s2360_s19 = scalar_lea.vmem %s29_s16, 32  ;;  %p2365_p1 = scmp.lt.s32.totalorder %s29_s16, %s29_s16 }
   0x5   :  { %p2361_p0 = scmp.ne.s32.totalorder %s29_s16, %s2360_s19  ;;  %p2366_p2 = scmp.lt.s32.totalorder %s2360_s19, %s2360_s19 }
   0x7   :  { %p2367_p3 = por %p2366_p2, %p2365_p1 }
   0x9   :  { %p2368_p4 = pnand %p2367_p3, %p2361_p0 }
   0xb   :  { %2371 = shalt.err (!%p2368_p4)
}
   0xc   :  { %31 = dma.hbm_to_vmem [thread:$0]  %s2822_s1, 32, %s29_s16, [#allocation6]  }
   0xd   :  { %s2380_s22 = scalar_lea.vmem %s19_s18, 32  ;;  %p2385_p6 = scmp.lt.s32.totalorder %s19_s18, %s19_s18 }
   0xe   :  { %p2381_p5 = scmp.ne.s32.totalorder %s19_s18, %s2380_s22  ;;  %p2386_p7 = scmp.lt.s32.totalorder %s2380_s22, %s2380_s22 }
  0x10   :  { %p2387_p8 = por %p2386_p7, %p2385_p6 }
  0x12   :  { %p2388_p9 = pnand %p2387_p8, %p2381_p5 }
  0x14   :  { %2391 = shalt.err (!%p2388_p9)
}
  0x15   :  { %21 = dma.hbm_to_vmem [thread:$0]  %s2821_s0, 32, %s19_s18, [#allocation3]  }
  0x16   :  { %s2440_s25 = smov [#allocation7]  }
  0x17   :  { %s37_s26 = sshll.u32 %s2440_s25, 4  ;;  %s38_s26 = int_to_ptr.vmem [resolvable:$true] %s37_s26 }
  0x18   :  { %s2400_s27 = scalar_lea.vmem %s38_s26, 256  ;;  %p2405_p11 = scmp.lt.s32.totalorder %s38_s26, %s38_s26 }
  0x19   :  { %p2401_p10 = scmp.ne.s32.totalorder %s38_s26, %s2400_s27  ;;  %p2406_p12 = scmp.lt.s32.totalorder %s2400_s27, %s2400_s27 }
  0x1b   :  { %p2407_p13 = por %p2406_p12, %p2405_p11 }
  0x1d   :  { %p2408_p0 = pnand %p2407_p13, %p2401_p10 }
  0x1f   :  { %2411 = shalt.err (!%p2408_p0)
}
  0x20   :  { %s2441_s1 = smov 64   ;;  %s2442_s28 = smov 4  }
  0x21   :  { %43 = dma.hbm_to_vmem [thread:$0]  %s2823_s2, 256, %s38_s26, [#allocation6], %s2441_s1, %s2441_s1, %s2442_s28  }
  0x22   :  { %2432 = dma.done.wait [#allocation3], 32  }
  0x23   :  { %2433 = vsyncadd [#allocation3], 4294967264 }
  0x24   :  { %2434 = dma.done.wait [#allocation6], 288  }
  0x25   :  { %2435 = vsyncadd [#allocation6], 4294967008  ;;  %v72_v0 = vlaneseq  ;;  %v2443_v1 = vmov 1966171168   ;;  %v2090_v6 = vld [vmem:[#allocation7 + $0x8] sm:$0xff]   ;;  %v2083_v16 = vld [vmem:[#allocation7] sm:$0xff]  }
  0x26   :  { %v70_v2 = vunpack.c.l.s4 %v2443_v1  ;;  %v57_v7 = vld [vmem:[#allocation5] sm:$0x3]  ;;  %v55_v9 = vld [vmem:[#allocation2] sm:$0x3]  ;;  %v2088_v10 = vunpack.c.l.bf16 %v2090_v6  ;;  %v2089_v11 = vunpack.c.h.bf16 %v2090_v6  ;;  %s2444_s0 = smov 96   ;;  %v2514_v21 = vunpack.c.h.bf16 %v2083_v16  ;;  %s2445_s2 = smov 32  }
  0x27   :  { %v2491_v3 = vshrl.u32 %v72_v0, 7  ;;  %v58_v12 = vunpack.c.l.bf16 %v57_v7  ;;  %v56_v13 = vunpack.c.l.bf16 %v55_v9  ;;  %v2519_v23 = vunpack.c.l.bf16 %v2083_v16  ;;  %v2557_v28 = vld [vmem:[%s2824_s3] sm:$0x3]  ;;  %s2448_s3 = smov 120   ;;  %s2449_s7 = smov 112  }
  0x28   :  { %v71_v4 = vunpack.c.0.s8 %v70_v2  ;;  %v2497_v14 = vpack.i.bf16 %v2088_v10, %v2089_v11  ;;  %2141 = vmatprep.subr.mxu0 %v2089_v11  ;;  %vm165_vm0 = vcmask 1040384   ;;  %vm168_vm1 = vcmask 1041408   ;;  %s2450_s8 = smov 104   ;;  %s2451_s9 = smov 8  }
  0x29   :  { %v2495_v8 = vsub.s32 0, %v2491_v3  ;;  %2142 = vmatpush3.msra.mxu0 %v2089_v11  ;;  %vm171_vm2 = vcmask 1042432   ;;  %vm174_vm3 = vcmask 1043456   ;;  %vm177_vm4 = vcmask 1044480   ;;  %s2452_s10 = smov 16   ;;  %s2453_s11 = smov 24  }
  0x2a   :  { %v74_v5 = vsub.s32 %v71_v4, %v2491_v3  ;;  %2272 = vrot.lane.b32.xlu0 %v2497_v14, %s2444_s0  ;;  %2143 = vmatprep.subr.mxu0 %v2088_v10  ;;  %vm180_vm5 = vcmask 1045504   ;;  %vm183_vm6 = vcmask 1046528   ;;  %vm301_vm7 = vcmask 261120   ;;  %s2454_s12 = smov [#allocation8]  }
  0x2b   :  { %2144 = vmatpush3.msra.mxu0 %v2088_v10  ;;  %v2564_v29 = vrot.slane %v2557_v28, %v2495_v8  ;;  %vm2447_vm8 = vmmov 0   ;;  %vm512_vm9 = vcmask 64512   ;;  %vm1827_vm10 = vcmask 130048   ;;  %s2041_s13 = sshll.u32 %s2454_s12, 4  ;;  %s2042_s13 = int_to_ptr.vmem [resolvable:$true] %s2041_s13 }
  0x2c   :  { %v2499_v15 = vrot.slane %v58_v12, %v74_v5  ;;  %v2509_v19 = vrot.slane %v56_v13, %v74_v5  ;;  %2145 = vmatprep.subr.mxu0 %v2514_v21  ;;  %vm1830_vm11 = vcmask 195584   ;;  %vm1973_vm12 = vcmask 1041409   ;;  %s2412_s14 = scalar_lea.vmem %s2042_s13, 64  ;;  %p2417_p2 = scmp.lt.s32.totalorder %s2042_s13, %s2042_s13 }
  0x2d   :  { %2146 = vmatpush3.msra.mxu0 %v2514_v21  ;;  %vm2016_vm13 = vcmask 523264   ;;  %vm2018_vm14 = vcmask 785408   ;;  %p2413_p1 = scmp.ne.s32.totalorder %s2042_s13, %s2412_s14  ;;  %p2418_p3 = scmp.lt.s32.totalorder %s2412_s14, %s2412_s14 }
  0x2e   :  { %v2505_v17 = vcombine.high %v2499_v15, %v2499_v15  ;;  %v220_v18 = vrot.slane %v2499_v15, %v2495_v8  ;;  %v102_v22 = vrot.slane %v2509_v19, %v2495_v8  ;;  %2147 = vmatprep.subr.mxu0 %v2519_v23  ;;  %v2539_v26 = vcombine.high %v2509_v19, %v2509_v19 }
  0x2f   :  { %2148 = vmatpush3.msra.mxu0 %v2519_v23  ;;  %v197_v35 = vrot.slane %v2499_v15, 1  ;;  %v79_v12 = vrot.slane %v2509_v19, 1  ;;  %p2419_p4 = por %p2418_p3, %p2417_p2 }
  0x30   :  { %201 = vrot.lane.b32.xlu1 %v2505_v17, %s2444_s0  ;;  %v2276_v20 = vpack.i.bf16 %v220_v18, %v2499_v15  ;;  %v2291_v24 = vpack.i.bf16 %v102_v22, %v2509_v19  ;;  %v224_v25 = vrot.slane %v2505_v17, %v2495_v8  ;;  %v106_v27 = vrot.slane %v2539_v26, %v2495_v8 }
  0x31   :  { %v246_v44 = vrot.slane %v197_v35, %v2495_v8  ;;  %v198_v4 = vrot.slane %v2505_v17, 1  ;;  %v80_v11 = vrot.slane %v2539_v26, 1  ;;  %p2420_p5 = pnand %p2419_p4, %p2413_p1 }
  0x32   :  { %2277 = vrot.lane.b32.xlu0 %v2276_v20, %s2444_s0 }
  0x34   :  { %2282 = vrot.lane.b32.xlu1 %v2276_v20, %s2441_s1 }
  0x36   :  { %2287 = vrot.lane.b32.xlu0 %v2276_v20, %s2445_s2 }
  0x38   :  { %207 = vrot.lane.b32.xlu1 %v2505_v17, %s2441_s1 }
  0x3a   :  { %2292 = vrot.lane.b32.xlu0 %v2291_v24, %s2444_s0 }
  0x3c   :  { %213 = vrot.lane.b32.xlu1 %v2505_v17, %s2445_s2 }
  0x3e   :  { %227 = vrot.lane.b32.xlu0 %v224_v25, %s2444_s0 }
  0x40   :  { %233 = vrot.lane.b32.xlu1 %v224_v25, %s2441_s1 }
  0x42   :  { %239 = vrot.lane.b32.xlu0 %v224_v25, %s2445_s2 }
  0x44   :  { %83 = vrot.lane.b32.xlu1 %v2539_v26, %s2444_s0 }
  0x46   :  { %2297 = vrot.lane.b32.xlu0 %v2291_v24, %s2441_s1 }
  0x48   :  { %109 = vrot.lane.b32.xlu1 %v106_v27, %s2444_s0 }
  0x4a   :  { %389 = vrot.lane.b32.xlu0 %v2514_v21, %s2444_s0 }
  0x4c   :  { %89 = vrot.lane.b32.xlu1 %v2539_v26, %s2441_s1 }
  0x4e   :  { %2302 = vrot.lane.b32.xlu0 %v2291_v24, %s2445_s2 }
  0x50   :  { %115 = vrot.lane.b32.xlu1 %v106_v27, %s2441_s1 }
  0x52   :  { %95 = vrot.lane.b32.xlu0 %v2539_v26, %s2445_s2 }
  0x54   :  { %121 = vrot.lane.b32.xlu1 %v106_v27, %s2445_s2 }
  0x56   :  { %387 = vrot.lane.b32.xlu0 %v2519_v23, %s2444_s0 }
  0x58   :  { %400 = vrot.lane.b32.xlu1 %v2564_v29, %s2444_s0 }
  0x9c   :  { %v2273_v30 = vpop.permute.xlu0 %2272 }
  0x9d   :  { %v2274_v31 = vunpack.i.l.bf16 %v2273_v30  ;;  %v2275_v33 = vunpack.i.h.bf16 %v2273_v30  ;;  %v132_v30 = vrot.slane %v80_v11, %v2495_v8 }
  0x9f   :  { %2152 = vmatprep.subr.mxu1 %v2274_v31 }
  0xa0   :  { %2153 = vmatpush3.msra.mxu1 %v2274_v31  ;;  %v128_v31 = vrot.slane %v79_v12, %v2495_v8 }
  0xa1   :  { %2154 = vmatprep.subr.mxu1 %v2275_v33 }
  0xa2   :  { %v2570_v32 = vpop.permute.xlu1 %201  ;;  %2155 = vmatpush3.msra.mxu1 %v2275_v33 }
  0xa3   :  { %v204_v16 = vrot.slane %v2570_v32, 1 }
  0xa4   :  { %v2278_v34 = vpop.permute.xlu0 %2277 }
  0xa5   :  { %v2280_v36 = vunpack.i.h.bf16 %v2278_v34  ;;  %v2279_v37 = vunpack.i.l.bf16 %v2278_v34 }
  0xa6   :  { %v2283_v38 = vpop.permute.xlu1 %2282 }
  0xa7   :  { %v283_v39 = vsel %vm165_vm0, %v2499_v15, %v2280_v36  ;;  %v203_v40 = vrot.slane %v2279_v37, 1  ;;  %v2285_v41 = vunpack.i.h.bf16 %v2283_v38  ;;  %v2284_v42 = vunpack.i.l.bf16 %v2283_v38 }
  0xa8   :  { %v2288_v43 = vpop.permute.xlu0 %2287  ;;  %v250_v15 = vrot.slane %v198_v4, %v2495_v8  ;;  %v260_v36 = vrot.slane %v204_v16, %v2495_v8 }
  0xa9   :  { %v285_v45 = vsel %vm168_vm1, %v283_v39, %v2285_v41  ;;  %v209_v46 = vrot.slane %v2284_v42, 1  ;;  %v2290_v47 = vunpack.i.h.bf16 %v2288_v43  ;;  %v2289_v48 = vunpack.i.l.bf16 %v2288_v43 }
  0xaa   :  { %v208_v49 = vpop.permute.xlu1 %207  ;;  %v256_v50 = vrot.slane %v203_v40, %v2495_v8 }
  0xab   :  { %v266_v51 = vrot.slane %v209_v46, %v2495_v8  ;;  %v287_v52 = vsel %vm171_vm2, %v285_v45, %v2290_v47  ;;  %v215_v53 = vrot.slane %v2289_v48, 1  ;;  %v210_v18 = vrot.slane %v208_v49, 1 }
  0xac   :  { %v2293_v54 = vpop.permute.xlu0 %2292  ;;  %v289_v55 = vsel %vm174_vm3, %v287_v52, %v246_v44 }
  0xad   :  { %v291_v56 = vsel %vm177_vm4, %v289_v55, %v256_v50  ;;  %v276_v57 = vrot.slane %v215_v53, %v2495_v8  ;;  %v2294_v6 = vunpack.i.l.bf16 %v2293_v54  ;;  %v2295_v13 = vunpack.i.h.bf16 %v2293_v54 }
  0xae   :  { %v2583_v58 = vpop.permute.xlu1 %213  ;;  %v293_v59 = vsel %vm180_vm5, %v291_v56, %v266_v51  ;;  %v270_v37 = vrot.slane %v210_v18, %v2495_v8 }
  0xaf   :  { %v295_v60 = vsel %vm183_vm6, %v293_v59, %v276_v57  ;;  %v85_v24 = vrot.slane %v2294_v6, 1  ;;  %v166_v33 = vsel %vm165_vm0, %v2509_v19, %v2295_v13  ;;  %v216_v38 = vrot.slane %v2583_v58, 1 }
  0xb0   :  { %v228_v61 = vpop.permute.xlu0 %227  ;;  %2160 = vmatprep.mubr.msk.f32.mxu1 %vm301_vm7, %v295_v60 }
  0xb1   :  { %v284_v1 = vsel %vm165_vm0, %v2505_v17, %v228_v61  ;;  %v138_v41 = vrot.slane %v85_v24, %v2495_v8 }
  0xb2   :  { %v234_v62 = vpop.permute.xlu1 %233 }
  0xb3   :  { %v286_v7 = vsel %vm168_vm1, %v284_v1, %v234_v62 }
  0xb4   :  { %v240_v63 = vpop.permute.xlu0 %239 }
  0xb5   :  { %v288_v20 = vsel %vm171_vm2, %v286_v7, %v240_v63 }
  0xb6   :  { %v84_v0 = vpop.permute.xlu1 %83  ;;  %v290_v34 = vsel %vm174_vm3, %v288_v20, %v250_v15 }
  0xb7   :  { %v86_v42 = vrot.slane %v84_v0, 1  ;;  %v292_v19 = vsel %vm177_vm4, %v290_v34, %v260_v36 }
  0xb8   :  { %v2298_v2 = vpop.permute.xlu0 %2297  ;;  %v294_v59 = vsel %vm180_vm5, %v292_v19, %v270_v37 }
  0xb9   :  { %v2299_v9 = vunpack.i.l.bf16 %v2298_v2  ;;  %v2300_v17 = vunpack.i.h.bf16 %v2298_v2  ;;  %v142_v56 = vrot.slane %v86_v42, %v2495_v8 }
  0xba   :  { %v110_v5 = vpop.permute.xlu1 %109 }
  0xbb   :  { %v91_v25 = vrot.slane %v2299_v9, 1  ;;  %v169_v39 = vsel %vm168_vm1, %v166_v33, %v2300_v17  ;;  %v167_v49 = vsel %vm165_vm0, %v2539_v26, %v110_v5  ;;  %v280_v26 = vrot.slane %v216_v38, %v2495_v8 }
  0xbc   :  { %v390_v10 = vpop.permute.xlu0 %389  ;;  %v2446_v5 = vmov 0.0  }
  0xbd   :  { %2156 = vmatprep.subr.mxu1 %v390_v10  ;;  %v148_v45 = vrot.slane %v91_v25, %v2495_v8  ;;  %v296_v1 = vsel %vm183_vm6, %v294_v59, %v280_v26  ;;  %2173 = vmatprep.subr.mxu0 %v2446_v5 }
  0xbe   :  { %2157 = vmatpush3.msra.mxu1 %v390_v10  ;;  %v90_v22 = vpop.permute.xlu1 %89 }
  0xbf   :  { %v92_v46 = vrot.slane %v90_v22, 1 }
  0xc0   :  { %v2303_v27 = vpop.permute.xlu0 %2302 }
  0xc1   :  { %v2305_v35 = vunpack.i.h.bf16 %v2303_v27  ;;  %v2304_v32 = vunpack.i.l.bf16 %v2303_v27  ;;  %v152_v60 = vrot.slane %v92_v46, %v2495_v8 }
  0xc2   :  { %v116_v40 = vpop.permute.xlu1 %115 }
  0xc3   :  { %v97_v43 = vrot.slane %v2304_v32, 1  ;;  %v172_v44 = vsel %vm171_vm2, %v169_v39, %v2305_v35  ;;  %v170_v53 = vsel %vm168_vm1, %v167_v49, %v116_v40 }
  0xc4   :  { %v96_v47 = vpop.permute.xlu0 %95  ;;  %v175_v48 = vsel %vm174_vm3, %v172_v44, %v128_v31 }
  0xc5   :  { %v158_v50 = vrot.slane %v97_v43, %v2495_v8  ;;  %v98_v51 = vrot.slane %v96_v47, 1  ;;  %v178_v52 = vsel %vm177_vm4, %v175_v48, %v138_v41 }
  0xc6   :  { %v122_v54 = vpop.permute.xlu1 %121  ;;  %v181_v55 = vsel %vm180_vm5, %v178_v52, %v148_v45 }
  0xc7   :  { %v173_v57 = vsel %vm171_vm2, %v170_v53, %v122_v54  ;;  %v2620_v58 = vsel %vm183_vm6, %v181_v55, %v158_v50  ;;  %v162_v63 = vrot.slane %v98_v51, %v2495_v8 }
  0xc8   :  { %v176_v61 = vsel %vm174_vm3, %v173_v57, %v132_v30  ;;  %2149 = vmatprep.mubr.msk.f32.mxu0 %vm301_vm7, %v2620_v58  ;;  %v388_v62 = vpop.permute.xlu0 %387 }
  0xc9   :  { %v179_v0 = vsel %vm177_vm4, %v176_v61, %v142_v56  ;;  %2158 = vmatprep.subr.mxu1 %v388_v62 }
  0xca   :  { %2159 = vmatpush3.msra.mxu1 %v388_v62  ;;  %v182_v2 = vsel %vm180_vm5, %v179_v0, %v152_v60  ;;  %v401_v8 = vpop.permute.xlu1 %400 }
  0xcb   :  { %2161 = vmatmul.mubr.msk.f32.vlgmr.msra.gmra.mxu1 %vm301_vm7, %v296_v1  ;;  %v2634_v4 = vsel %vm183_vm6, %v182_v2, %v162_v63  ;;  %2163 = vmatprep.subr.mxu1 %v2446_v5 }
  0xcc   :  { %2150 = vmatmul.mubr.msk.f32.vlgmr.msra.gmra.mxu0 %vm301_vm7, %v2634_v4  ;;  %2165 = vmatprep.mubr.msk.f32.mxu1 %vm2447_vm8, %v2446_v5 }
  0xcd   :  { %2175 = vmatprep.mubr.msk.f32.mxu0 %vm2447_vm8, %v2446_v5 }
 0x18b   :  { %v2162_v6 = vpop.f32.mrf.mxu1 }
 0x18c   :  { %v2644_v7 = vadd.f32 %v2162_v6, %v401_v8  ;;  %v2151_v9 = vpop.f32.mrf.mxu0 }
 0x18d   :  { %v475_v10 = vpop.f32.mrf.mxu1  ;;  %v380_v13 = vadd.f32 %v2151_v9, %v2564_v29 }
 0x18e   :  { %v2646_v11 = vadd.f32 %v475_v10, %v401_v8  ;;  %502 = vrot.lane.b32.xlu1 %v2644_v7, %s2448_s3  ;;  %v374_v12 = vpop.f32.mrf.mxu0 }
 0x18f   :  { %v375_v15 = vadd.f32 %v374_v12, %v2564_v29 }
 0x190   :  { %500 = vrot.lane.b32.xlu0 %v2646_v11, %s2448_s3  ;;  %2164 = vmatpush3.xpose.msk.msra.mxu1 %vm512_vm9, %v2646_v11 }
 0x191   :  { %2168 = vmatprep.subr.mxu1 %v2446_v5 }
 0x192   :  { %488 = vrot.lane.b32.xlu1 %v380_v13, %s2448_s3 }
 0x193   :  { %2166 = vmatmul.mubr.msk.f32.vlgmr.msra.gmra.mxu1 %vm512_vm9, %v375_v15 }
 0x194   :  { %486 = vrot.lane.b32.xlu0 %v375_v15, %s2448_s3  ;;  %2169 = vmatpush3.xpose.msk.msra.mxu1 %vm512_vm9, %v2644_v7 }
 0x195   :  { %2170 = vmatprep.mubr.msk.f32.mxu1 %vm2447_vm8, %v2446_v5  ;;  %2178 = vmatprep.subr.mxu1 %v2446_v5 }
 0x196   :  { %506 = vrot.lane.b32.xlu1 %v2644_v7, %s2449_s7 }
 0x197   :  { %2171 = vmatmul.mubr.msk.f32.vlgmr.msra.gmra.mxu1 %vm512_vm9, %v380_v13 }
 0x198   :  { %504 = vrot.lane.b32.xlu0 %v2646_v11, %s2449_s7  ;;  %2180 = vmatprep.mubr.msk.f32.mxu1 %vm2447_vm8, %v2446_v5 }
 0x19a   :  { %492 = vrot.lane.b32.xlu1 %v380_v13, %s2449_s7 }
 0x19c   :  { %490 = vrot.lane.b32.xlu0 %v375_v15, %s2449_s7 }
 0x19e   :  { %510 = vrot.lane.b32.xlu1 %v2644_v7, %s2450_s8 }
 0x1a0   :  { %508 = vrot.lane.b32.xlu0 %v2646_v11, %s2450_s8 }
 0x1a2   :  { %496 = vrot.lane.b32.xlu1 %v380_v13, %s2450_s8 }
 0x1a4   :  { %494 = vrot.lane.b32.xlu0 %v375_v15, %s2450_s8 }
 0x200   :  { %v2668_v16 = vpop.permute.xlu1 %502 }
 0x201   :  { %2179 = vmatpush3.xpose.msk.msra.mxu1 %vm512_vm9, %v2668_v16 }
 0x202   :  { %v2672_v18 = vpop.permute.xlu0 %500  ;;  %2188 = vmatprep.subr.mxu1 %v2446_v5 }
 0x203   :  { %2174 = vmatpush3.xpose.msk.msra.mxu0 %vm512_vm9, %v2672_v18 }
 0x204   :  { %v489_v20 = vpop.permute.xlu1 %488  ;;  %2183 = vmatprep.subr.mxu0 %v2446_v5 }
 0x205   :  { %2181 = vmatmul.mubr.msk.f32.vlgmr.msra.gmra.mxu1 %vm512_vm9, %v489_v20 }
 0x206   :  { %v487_v17 = vpop.permute.xlu0 %486  ;;  %2190 = vmatprep.mubr.msk.f32.mxu1 %vm2447_vm8, %v2446_v5 }
 0x207   :  { %2176 = vmatmul.mubr.msk.f32.vlgmr.msra.gmra.mxu0 %vm512_vm9, %v487_v17 }
 0x208   :  { %v507_v22 = vpop.permute.xlu1 %506  ;;  %2185 = vmatprep.mubr.msk.f32.mxu0 %vm2447_vm8, %v2446_v5 }
 0x209   :  { %2189 = vmatpush3.xpose.msk.msra.mxu1 %vm512_vm9, %v507_v22 }
 0x20a   :  { %v505_v24 = vpop.permute.xlu0 %504  ;;  %2198 = vmatprep.subr.mxu1 %v2446_v5 }
 0x20b   :  { %2184 = vmatpush3.xpose.msk.msra.mxu0 %vm512_vm9, %v505_v24 }
 0x20c   :  { %v493_v25 = vpop.permute.xlu1 %492  ;;  %2193 = vmatprep.subr.mxu0 %v2446_v5 }
 0x20d   :  { %2191 = vmatmul.mubr.msk.f32.vlgmr.msra.gmra.mxu1 %vm512_vm9, %v493_v25 }
 0x20e   :  { %v491_v27 = vpop.permute.xlu0 %490  ;;  %2200 = vmatprep.mubr.msk.f32.mxu1 %vm2447_vm8, %v2446_v5 }
 0x20f   :  { %2186 = vmatmul.mubr.msk.f32.vlgmr.msra.gmra.mxu0 %vm512_vm9, %v491_v27 }
 0x210   :  { %v2692_v30 = vpop.permute.xlu1 %510  ;;  %2195 = vmatprep.mubr.msk.f32.mxu0 %vm2447_vm8, %v2446_v5 }
 0x211   :  { %2199 = vmatpush3.xpose.msk.msra.mxu1 %vm512_vm9, %v2692_v30 }
 0x212   :  { %v2698_v31 = vpop.permute.xlu0 %508  ;;  %2208 = vmatprep.subr.mxu1 %v2446_v5 }
 0x213   :  { %2194 = vmatpush3.xpose.msk.msra.mxu0 %vm512_vm9, %v2698_v31 }
 0x214   :  { %v497_v33 = vpop.permute.xlu1 %496  ;;  %2203 = vmatprep.subr.mxu0 %v2446_v5 }
 0x215   :  { %2201 = vmatmul.mubr.msk.f32.vlgmr.msra.gmra.mxu1 %vm512_vm9, %v497_v33 }
 0x216   :  { %v495_v34 = vpop.permute.xlu0 %494  ;;  %2210 = vmatprep.mubr.msk.f32.mxu1 %vm2447_vm8, %v2446_v5 }
 0x217   :  { %2196 = vmatmul.mubr.msk.f32.vlgmr.msra.gmra.mxu0 %vm512_vm9, %v495_v34 }
 0x218   :  { %2205 = vmatprep.mubr.msk.f32.mxu0 %vm2447_vm8, %v2446_v5 }
 0x253   :  { %v583_v35 = vpop.f32.mrf.mxu1 }
 0x254   :  { %v1105_v32 = vsel %vm512_vm9, %v583_v35, -inf }
 0x255   :  { %1106 = vmax.xlane.f32.xlu0 %v1105_v32  ;;  %v2167_v36 = vpop.f32.mrf.mxu1 }
 0x257   :  { %v657_v37 = vpop.f32.mrf.mxu1 }
 0x258   :  { %v1108_v38 = vsel %vm512_vm9, %v657_v37, -inf }
 0x259   :  { %1109 = vmax.xlane.f32.xlu1 %v1108_v38  ;;  %v2172_v39 = vpop.f32.mrf.mxu1 }
 0x2c5   :  { %v805_v40 = vpop.f32.mrf.mxu1 }
 0x2c6   :  { %v1114_v19 = vsel %vm512_vm9, %v805_v40, -inf }
 0x2c7   :  { %v731_v41 = vpop.f32.mrf.mxu0  ;;  %v2182_v42 = vpop.f32.mrf.mxu1 }
 0x2c8   :  { %v1111_v43 = vsel %vm512_vm9, %v731_v41, -inf }
 0x2c9   :  { %v2177_v44 = vpop.f32.mrf.mxu0  ;;  %1112 = vmax.xlane.f32.xlu0 %v1111_v43 }
 0x2cd   :  { %1115 = vmax.xlane.f32.xlu0 %v1114_v19  ;;  %v953_v45 = vpop.f32.mrf.mxu1 }
 0x2ce   :  { %v1120_v49 = vsel %vm512_vm9, %v953_v45, -inf }
 0x2cf   :  { %v879_v46 = vpop.f32.mrf.mxu0  ;;  %v2192_v47 = vpop.f32.mrf.mxu1 }
 0x2d0   :  { %v1117_v48 = vsel %vm512_vm9, %v879_v46, -inf }
 0x2d1   :  { %v2187_v50 = vpop.f32.mrf.mxu0  ;;  %1118 = vmax.xlane.f32.xlu1 %v1117_v48  ;;  %1121 = vmax.xlane.f32.xlu0 %v1120_v49 }
 0x2d5   :  { %v1101_v51 = vpop.f32.mrf.mxu1 }
 0x2d6   :  { %v1126_v52 = vsel %vm512_vm9, %v1101_v51, -inf }
 0x2d7   :  { %v1027_v53 = vpop.f32.mrf.mxu0  ;;  %1127 = vmax.xlane.f32.xlu0 %v1126_v52  ;;  %v2202_v54 = vpop.f32.mrf.mxu1 }
 0x2d8   :  { %v1123_v55 = vsel %vm512_vm9, %v1027_v53, -inf }
 0x2d9   :  { %v2197_v56 = vpop.f32.mrf.mxu0  ;;  %1124 = vmax.xlane.f32.xlu1 %v1123_v55 }
 0x2de   :  { %v1107_v60 = vpop.xlane.xlu0 %1106 }
 0x2df   :  { %v1129_v61 = vsub.f32 %v583_v35, %v1107_v60 }
 0x2e1   :  { %v1137_v62 = vmul.f32 1.442695, %v1129_v61 }
 0x2e2   :  { %v1110_v57 = vpop.xlane.xlu1 %1109 }
 0x2e3   :  { %v1130_v59 = vsub.f32 %v657_v37, %v1110_v57 }
 0x2e5   :  { %v1139_v26 = vmul.f32 1.442695, %v1130_v59 }
 0x2e7   :  { %2316 = vpow2.f32 %v1139_v26 }
 0x2e8   :  { %2318 = vpow2.f32 %v1137_v62 }
 0x2ea   :  { %1193 = vrot.lane.b32.xlu1 %v2646_v11, %s2444_s0 }
 0x2ed   :  { %1269 = vrot.lane.b32.xlu0 %v2644_v7, %s2444_s0 }
 0x2ee   :  { %1345 = vrot.lane.b32.xlu1 %v2672_v18, %s2444_s0 }
 0x2f1   :  { %1497 = vrot.lane.b32.xlu0 %v505_v24, %s2444_s0 }
 0x2f2   :  { %1421 = vrot.lane.b32.xlu1 %v2668_v16, %s2444_s0 }
 0x2f4   :  { %v2728_v63 = vpop.eup %2316 }
 0x2f5   :  { %v1156_v0 = vsel %vm512_vm9, %v2728_v63, 0.0  ;;  %v2732_v1 = vpop.eup %2318 }
 0x2f6   :  { %1573 = vrot.lane.b32.xlu1 %v507_v22, %s2444_s0  ;;  %v1153_v2 = vsel %vm512_vm9, %v2732_v1, 0.0 }
 0x310   :  { %1157 = vadd.xlane.f32.xlu0 %v1156_v0 }
 0x31a   :  { %1154 = vadd.xlane.f32.xlu1 %v1153_v2 }
 0x352   :  { %v1113_v8 = vpop.xlane.xlu0 %1112 }
 0x353   :  { %v1131_v6 = vsub.f32 %v731_v41, %v1113_v8 }
 0x355   :  { %v1141_v7 = vmul.f32 1.442695, %v1131_v6 }
 0x356   :  { %v1116_v9 = vpop.xlane.xlu0 %1115 }
 0x357   :  { %2320 = vpow2.f32 %v1141_v7  ;;  %v1132_v10 = vsub.f32 %v805_v40, %v1116_v9 }
 0x359   :  { %v1143_v11 = vmul.f32 1.442695, %v1132_v10 }
 0x35a   :  { %v1119_v12 = vpop.xlane.xlu1 %1118  ;;  %v1122_v13 = vpop.xlane.xlu0 %1121 }
 0x35b   :  { %2322 = vpow2.f32 %v1143_v11  ;;  %v1133_v15 = vsub.f32 %v879_v46, %v1119_v12  ;;  %v1134_v16 = vsub.f32 %v953_v45, %v1122_v13  ;;  %v2311_v13 = vpack.i.bf16 %v2519_v23, %v2514_v21 }
 0x35d   :  { %v1145_v18 = vmul.f32 1.442695, %v1133_v15  ;;  %v1147_v20 = vmul.f32 1.442695, %v1134_v16 }
 0x35f   :  { %2324 = vpow2.f32 %v1145_v18 }
 0x360   :  { %2326 = vpow2.f32 %v1147_v20  ;;  %v1128_v17 = vpop.xlane.xlu0 %1127 }
 0x361   :  { %v1136_v22 = vsub.f32 %v1101_v51, %v1128_v17 }
 0x362   :  { %v1125_v24 = vpop.xlane.xlu1 %1124 }
 0x363   :  { %v1151_v25 = vmul.f32 1.442695, %v1136_v22  ;;  %v1135_v27 = vsub.f32 %v1027_v53, %v1125_v24 }
 0x364   :  { %v2321_v33 = vpop.eup %2320  ;;  %v1270_v34 = vpop.permute.xlu0 %1269 }
 0x365   :  { %2328 = vpow2.f32 %v1151_v25  ;;  %v1149_v35 = vmul.f32 1.442695, %v1135_v27  ;;  %2209 = vmatpush3.msra.mxu1 %v1270_v34  ;;  %v1159_v32 = vsel %vm512_vm9, %v2321_v33, 0.0 }
 0x366   :  { %1160 = vadd.xlane.f32.xlu1 %v1159_v32  ;;  %v1194_v36 = vpop.permute.xlu1 %1193  ;;  %2218 = vmatprep.subr.mxu1 %v2446_v5 }
 0x367   :  { %2330 = vpow2.f32 %v1149_v35  ;;  %2204 = vmatpush3.msra.mxu0 %v1194_v36 }
 0x368   :  { %v2323_v37 = vpop.eup %2322  ;;  %2213 = vmatprep.subr.mxu0 %v2446_v5  ;;  %v1498_v47 = vpop.permute.xlu0 %1497 }
 0x369   :  { %v1162_v38 = vsel %vm512_vm9, %v2323_v37, 0.0 }
 0x36a   :  { %1163 = vadd.xlane.f32.xlu0 %v1162_v38  ;;  %v1346_v46 = vpop.permute.xlu1 %1345 }
 0x36c   :  { %v2325_v39 = vpop.eup %2324 }
 0x36d   :  { %v2327_v40 = vpop.eup %2326  ;;  %v1165_v41 = vsel %vm512_vm9, %v2325_v39, 0.0 }
 0x36e   :  { %1166 = vadd.xlane.f32.xlu1 %v1165_v41  ;;  %v1168_v42 = vsel %vm512_vm9, %v2327_v40, 0.0  ;;  %v1422_v48 = vpop.permute.xlu1 %1421 }
 0x36f   :  { %1169 = vadd.xlane.f32.xlu0 %v1168_v42 }
 0x372   :  { %v2742_v43 = vpop.eup %2328  ;;  %v1574_v50 = vpop.permute.xlu1 %1573 }
 0x373   :  { %v1174_v44 = vsel %vm512_vm9, %v2742_v43, 0.0 }
 0x374   :  { %v2746_v19 = vpop.eup %2330  ;;  %1175 = vadd.xlane.f32.xlu0 %v1174_v44 }
 0x375   :  { %v1171_v45 = vsel %vm512_vm9, %v2746_v19, 0.0 }
 0x376   :  { %1172 = vadd.xlane.f32.xlu1 %v1171_v45 }
 0x387   :  { %1725 = vrot.lane.b32.xlu1 %v2692_v30, %s2444_s0 }
 0x38a   :  { %1649 = vrot.lane.b32.xlu0 %v2698_v31, %s2444_s0 }
 0x38e   :  { %2307 = vrot.lane.b32.xlu0 %v2497_v14, %s2445_s2 }
 0x392   :  { %2312 = vrot.lane.b32.xlu0 %v2311_v13, %s2445_s2 }
 0x399   :  { %v1158_v49 = vpop.xlane.xlu0 %1157 }
 0x39a   :  { %2332 = vrcp.f32 %v1158_v49 }
 0x3a3   :  { %v1155_v51 = vpop.xlane.xlu1 %1154 }
 0x3a4   :  { %2334 = vrcp.f32 %v1155_v51 }
 0x3a7   :  { %v2333_v52 = vpop.eup %2332 }
 0x3a8   :  { %v1186_v53 = vmul.f32 %v2333_v52, %v2728_v63 }
 0x3aa   :  { %2211 = vmatmul.mubr.msk.f32.vlgmr.msra.gmra.mxu1 %vm512_vm9, %v1186_v53 }
 0x3ab   :  { %2219 = vmatpush3.msra.mxu1 %v1422_v48  ;;  %2220 = vmatprep.mubr.msk.f32.mxu1 %vm2447_vm8, %v2446_v5 }
 0x3ac   :  { %2228 = vmatprep.subr.mxu1 %v2446_v5 }
 0x3b1   :  { %v2335_v30 = vpop.eup %2334 }
 0x3b2   :  { %v1185_v31 = vmul.f32 %v2335_v30, %v2732_v1 }
 0x3b4   :  { %2206 = vmatmul.mubr.msk.f32.vlgmr.msra.gmra.mxu0 %vm512_vm9, %v1185_v31 }
 0x3b5   :  { %2214 = vmatpush3.msra.mxu0 %v1346_v46  ;;  %2215 = vmatprep.mubr.msk.f32.mxu0 %vm2447_vm8, %v2446_v5 }
 0x3b6   :  { %2223 = vmatprep.subr.mxu0 %v2446_v5 }
 0x3ef   :  { %v1161_v54 = vpop.xlane.xlu1 %1160 }
 0x3f0   :  { %2336 = vrcp.f32 %v1161_v54 }
 0x3f3   :  { %v1164_v55 = vpop.xlane.xlu0 %1163 }
 0x3f4   :  { %2338 = vrcp.f32 %v1164_v55 }
 0x3f7   :  { %v1167_v56 = vpop.xlane.xlu1 %1166 }
 0x3f8   :  { %2340 = vrcp.f32 %v1167_v56  ;;  %v1170_v57 = vpop.xlane.xlu0 %1169 }
 0x3f9   :  { %2342 = vrcp.f32 %v1170_v57 }
 0x3fd   :  { %v2337_v59 = vpop.eup %2336  ;;  %v1176_v26 = vpop.xlane.xlu0 %1175 }
 0x3fe   :  { %2344 = vrcp.f32 %v1176_v26  ;;  %v1187_v60 = vmul.f32 %v2337_v59, %v2321_v33 }
 0x3ff   :  { %v1173_v61 = vpop.xlane.xlu1 %1172 }
 0x400   :  { %2346 = vrcp.f32 %v1173_v61  ;;  %2216 = vmatmul.mubr.msk.f32.vlgmr.msra.gmra.mxu0 %vm512_vm9, %v1187_v60 }
 0x401   :  { %v2339_v62 = vpop.eup %2338  ;;  %2224 = vmatpush3.msra.mxu0 %v1498_v47  ;;  %2225 = vmatprep.mubr.msk.f32.mxu0 %vm2447_vm8, %v2446_v5  ;;  %v1650_v6 = vpop.permute.xlu0 %1649 }
 0x402   :  { %v1188_v63 = vmul.f32 %v2339_v62, %v2323_v37  ;;  %2233 = vmatprep.subr.mxu0 %v2446_v5 }
 0x403   :  { %v1726_v7 = vpop.permute.xlu1 %1725 }
 0x404   :  { %2221 = vmatmul.mubr.msk.f32.vlgmr.msra.gmra.mxu1 %vm512_vm9, %v1188_v63 }
 0x405   :  { %v2341_v0 = vpop.eup %2340  ;;  %2229 = vmatpush3.msra.mxu1 %v1574_v50  ;;  %2230 = vmatprep.mubr.msk.f32.mxu1 %vm2447_vm8, %v2446_v5  ;;  %v2308_v20 = vpop.permute.xlu0 %2307 }
 0x406   :  { %v2343_v1 = vpop.eup %2342  ;;  %2238 = vmatprep.subr.mxu1 %v2446_v5  ;;  %v1189_v2 = vmul.f32 %v2341_v0, %v2325_v39  ;;  %v2310_v17 = vunpack.i.h.bf16 %v2308_v20  ;;  %v2309_v22 = vunpack.i.l.bf16 %v2308_v20 }
 0x407   :  { %v1190_v8 = vmul.f32 %v2343_v1, %v2327_v40 }
 0x408   :  { %2226 = vmatmul.mubr.msk.f32.vlgmr.msra.gmra.mxu0 %vm512_vm9, %v1189_v2 }
 0x409   :  { %2231 = vmatmul.mubr.msk.f32.vlgmr.msra.gmra.mxu1 %vm512_vm9, %v1190_v8  ;;  %2234 = vmatpush3.msra.mxu0 %v1650_v6  ;;  %v2313_v24 = vpop.permute.xlu0 %2312 }
 0x40a   :  { %2239 = vmatpush3.msra.mxu1 %v1726_v7  ;;  %2240 = vmatprep.mubr.msk.f32.mxu1 %vm2447_vm8, %v2446_v5  ;;  %v2315_v25 = vunpack.i.h.bf16 %v2313_v24  ;;  %v2314_v27 = vunpack.i.l.bf16 %v2313_v24 }
 0x40b   :  { %v2345_v9 = vpop.eup %2344  ;;  %2235 = vmatprep.mubr.msk.f32.mxu0 %vm2447_vm8, %v2446_v5  ;;  %2243 = vmatprep.subr.mxu0 %v2309_v22 }
 0x40c   :  { %v1192_v10 = vmul.f32 %v2345_v9, %v2742_v43 }
 0x40d   :  { %v2347_v11 = vpop.eup %2346 }
 0x40e   :  { %2241 = vmatmul.mubr.msk.f32.vlgmr.msra.gmra.mxu1 %vm512_vm9, %v1192_v10  ;;  %v1191_v12 = vmul.f32 %v2347_v11, %v2746_v19 }
 0x410   :  { %2236 = vmatmul.mubr.msk.f32.vlgmr.msra.gmra.mxu0 %vm512_vm9, %v1191_v12 }
 0x411   :  { %2244 = vmatpush3.msra.mxu0 %v2309_v22 }
 0x412   :  { %2245 = vmatprep.subr.mxu0 %v2310_v17 }
 0x413   :  { %2246 = vmatpush3.msra.mxu0 %v2310_v17 }
 0x414   :  { %2247 = vmatprep.subr.mxu0 %v2314_v27 }
 0x415   :  { %2248 = vmatpush3.msra.mxu0 %v2314_v27 }
 0x416   :  { %2249 = vmatprep.subr.mxu0 %v2315_v25 }
 0x417   :  { %2250 = vmatpush3.msra.mxu0 %v2315_v25 }
 0x46a   :  { %v1341_v15 = vpop.f32.mrf.mxu1 }
 0x46c   :  { %v2212_v16 = vpop.f32.mrf.mxu1 }
 0x474   :  { %v1265_v5 = vpop.f32.mrf.mxu0 }
 0x476   :  { %v2207_v18 = vpop.f32.mrf.mxu0 }
 0x4c0   :  { %v1417_v14 = vpop.f32.mrf.mxu0 }
 0x4c2   :  { %v2217_v21 = vpop.f32.mrf.mxu0 }
 0x4c4   :  { %v1493_v23 = vpop.f32.mrf.mxu1 }
 0x4c5   :  { %1805 = vrot.lane.b32.xlu1 %v1493_v23, %s2451_s9 }
 0x4c6   :  { %v2222_v33 = vpop.f32.mrf.mxu1 }
 0x4c8   :  { %v1569_v34 = vpop.f32.mrf.mxu0 }
 0x4c9   :  { %v1645_v35 = vpop.f32.mrf.mxu1  ;;  %1811 = vrot.lane.b32.xlu0 %v1569_v34, %s2452_s10  ;;  %1803 = vrot.lane.b32.xlu1 %v1417_v14, %s2451_s9 }
 0x4ca   :  { %v2227_v32 = vpop.f32.mrf.mxu0 }
 0x4cb   :  { %v2232_v36 = vpop.f32.mrf.mxu1 }
 0x4cd   :  { %1813 = vrot.lane.b32.xlu1 %v1645_v35, %s2452_s10 }
 0x4ce   :  { %v1797_v37 = vpop.f32.mrf.mxu1 }
 0x4d0   :  { %v1721_v38 = vpop.f32.mrf.mxu0  ;;  %v2242_v39 = vpop.f32.mrf.mxu1 }
 0x4d1   :  { %1819 = vrot.lane.b32.xlu0 %v1721_v38, %s2453_s11  ;;  %1821 = vrot.lane.b32.xlu1 %v1797_v37, %s2453_s11 }
 0x4d2   :  { %v2237_v40 = vpop.f32.mrf.mxu0 }
 0x4d5   :  { %1845 = vrot.lane.b32.xlu0 %v2564_v29, %s2445_s2 }
 0x537   :  { %v1806_v41 = vpop.permute.xlu1 %1805 }
 0x538   :  { %v1826_v45 = vsel %vm512_vm9, %v1341_v15, %v1806_v41 }
 0x53b   :  { %v1804_v42 = vpop.permute.xlu1 %1803  ;;  %v1812_v43 = vpop.permute.xlu0 %1811 }
 0x53c   :  { %v1825_v19 = vsel %vm512_vm9, %v1265_v5, %v1804_v42 }
 0x53d   :  { %v1828_v48 = vsel %vm1827_vm10, %v1825_v19, %v1812_v43 }
 0x53f   :  { %v1814_v44 = vpop.permute.xlu1 %1813 }
 0x540   :  { %v1829_v46 = vsel %vm1827_vm10, %v1826_v45, %v1814_v44 }
 0x543   :  { %v1820_v47 = vpop.permute.xlu0 %1819  ;;  %v1822_v49 = vpop.permute.xlu1 %1821 }
 0x544   :  { %v1831_v50 = vsel %vm1830_vm11, %v1828_v48, %v1820_v47  ;;  %v1832_v51 = vsel %vm1830_vm11, %v1829_v46, %v1822_v49 }
 0x545   :  { %2251 = vmatprep.mubr.msk.f32.mxu0 %vm301_vm7, %v1831_v50 }
 0x546   :  { %2252 = vmatmul.mubr.msk.f32.vlgmr.msra.gmra.mxu0 %vm301_vm7, %v1832_v51 }
 0x547   :  { %v1846_v29 = vpop.permute.xlu0 %1845 }
 0x606   :  { %v2253_v52 = vpop.f32.mrf.mxu0 }
 0x607   :  { %v1926_v53 = vadd.f32 %v2253_v52, %v1846_v29 }
 0x608   :  { %v1920_v30 = vpop.f32.mrf.mxu0 }
 0x609   :  { %v1921_v31 = vadd.f32 %v1920_v30, %v1846_v29  ;;  %v1930_v54 = vadd.f32 %v1926_v53, %v2634_v4 }
 0x60b   :  { %v1934_v55 = vsel %vm301_vm7, %v1930_v54, 0.0  ;;  %v1929_v56 = vadd.f32 %v1921_v31, %v2620_v58  ;;  %v1960_v58 = vsub.s32 1, %v2491_v3 }
 0x60c   :  { %1935 = vadd.xlane.f32.xlu0 %v1934_v55 }
 0x60d   :  { %v1931_v57 = vsel %vm301_vm7, %v1929_v56, 0.0  ;;  %v1961_v8 = vrot.slane %v2557_v28, %v1960_v58 }
 0x60e   :  { %1932 = vadd.xlane.f32.xlu1 %v1931_v57 }
 0x695   :  { %v1936_v59 = vpop.xlane.xlu0 %1935 }
 0x696   :  { %v1939_v26 = vmul.f32 0.03125, %v1936_v59 }
 0x697   :  { %v1933_v60 = vpop.xlane.xlu1 %1932 }
 0x698   :  { %v1941_v61 = vsub.f32 %v1930_v54, %v1939_v26  ;;  %v1938_v62 = vmul.f32 0.03125, %v1933_v60 }
 0x69a   :  { %v1940_v63 = vsub.f32 %v1929_v56, %v1938_v62  ;;  %v1943_v0 = vmul.f32 %v1941_v61, %v1941_v61 }
 0x69c   :  { %v1947_v1 = vsel %vm301_vm7, %v1943_v0, 0.0  ;;  %v1942_v2 = vmul.f32 %v1940_v63, %v1940_v63 }
 0x69d   :  { %1948 = vadd.xlane.f32.xlu1 %v1947_v1 }
 0x69e   :  { %v1944_v4 = vsel %vm301_vm7, %v1942_v2, 0.0 }
 0x69f   :  { %1945 = vadd.xlane.f32.xlu0 %v1944_v4 }
 0x6b5   :  { %1965 = vrot.lane.b32.xlu0 %v1961_v8, %s2444_s0 }
 0x726   :  { %v1949_v6 = vpop.xlane.xlu1 %1948 }
 0x727   :  { %v1951_v7 = vmul.f32 0.03125, %v1949_v6 }
 0x728   :  { %v1946_v9 = vpop.xlane.xlu0 %1945 }
 0x729   :  { %v1953_v10 = vadd.f32 1e-12, %v1951_v7  ;;  %v1950_v11 = vmul.f32 0.03125, %v1946_v9 }
 0x72b   :  { %2348 = vrsqrt.f32 %v1953_v10  ;;  %v1952_v12 = vadd.f32 1e-12, %v1950_v11 }
 0x72c   :  { %v1966_v5 = vpop.permute.xlu0 %1965 }
 0x72d   :  { %2350 = vrsqrt.f32 %v1952_v12 }
 0x738   :  { %v2349_v13 = vpop.eup %2348 }
 0x739   :  { %v1957_v15 = vmul.f32 %v2349_v13, %v1941_v61 }
 0x73a   :  { %v2351_v16 = vpop.eup %2350 }
 0x73b   :  { %v1956_v18 = vmul.f32 %v2351_v16, %v1940_v63  ;;  %v1963_v20 = vmul.f32 %v1961_v8, %v1957_v15 }
 0x73d   :  { %v1962_v17 = vmul.f32 %v1961_v8, %v1956_v18  ;;  %v1969_v3 = vadd.f32 %v1966_v5, %v1963_v20 }
 0x73f   :  { %v1968_v22 = vadd.f32 %v1966_v5, %v1962_v17  ;;  %v1972_v28 = vrot.slane %v1969_v3, 7  ;;  %v1982_v25 = vrot.slane %v1969_v3, 1  ;;  %v1994_v23 = vrot.slane %v1969_v3, 3 }
 0x740   :  { %v1988_v37 = vrot.slane %v1969_v3, 2  ;;  %v1998_v38 = vrot.slane %v1969_v3, 4  ;;  %v2004_v42 = vrot.slane %v1969_v3, 5  ;;  %v2010_v19 = vrot.slane %v1969_v3, 6 }
 0x741   :  { %v1981_v24 = vrot.slane %v1968_v22, 2  ;;  %v1976_v27 = vrot.slane %v1968_v22, 1  ;;  %v1974_v14 = vsel %vm1973_vm12, %v1972_v28, %v1968_v22  ;;  %v1993_v21 = vrot.slane %v1968_v22, 4 }
 0x742   :  { %v1987_v35 = vrot.slane %v1968_v22, 3  ;;  %v1997_v32 = vrot.slane %v1968_v22, 5  ;;  %v2003_v41 = vrot.slane %v1968_v22, 6  ;;  %v2009_v44 = vrot.slane %v1968_v22, 7 }
 0x743   :  { %v1983_v33 = vsel %vm1973_vm12, %v1982_v25, %v1981_v24  ;;  %v1977_v34 = vsel %vm1973_vm12, %v1969_v3, %v1976_v27  ;;  %v1995_v36 = vsel %vm1973_vm12, %v1994_v23, %v1993_v21 }
 0x744   :  { %1984 = vrot.lane.b32.xlu0 %v1983_v33, %s2441_s1  ;;  %1978 = vrot.lane.b32.xlu1 %v1977_v34, %s2445_s2  ;;  %v1989_v39 = vsel %vm1973_vm12, %v1988_v37, %v1987_v35  ;;  %v1999_v40 = vsel %vm1973_vm12, %v1998_v38, %v1997_v32  ;;  %v2005_v43 = vsel %vm1973_vm12, %v2004_v42, %v2003_v41 }
 0x745   :  { %v2011_v45 = vsel %vm1973_vm12, %v2010_v19, %v2009_v44 }
 0x748   :  { %1990 = vrot.lane.b32.xlu0 %v1989_v39, %s2444_s0  ;;  %2000 = vrot.lane.b32.xlu1 %v1999_v40, %s2445_s2 }
 0x74c   :  { %2006 = vrot.lane.b32.xlu1 %v2005_v43, %s2441_s1 }
 0x750   :  { %2012 = vrot.lane.b32.xlu1 %v2011_v45, %s2444_s0 }
 0x7b6   :  { %v1979_v46 = vpop.permute.xlu1 %1978  ;;  %v1985_v47 = vpop.permute.xlu0 %1984 }
 0x7b7   :  { %v2015_v50 = vsel %vm301_vm7, %v1974_v14, %v1979_v46 }
 0x7b8   :  { %v2017_v52 = vsel %vm2016_vm13, %v2015_v50, %v1985_v47 }
 0x7ba   :  { %v2001_v48 = vpop.permute.xlu1 %2000  ;;  %v1991_v51 = vpop.permute.xlu0 %1990 }
 0x7bb   :  { %v2020_v29 = vsel %vm301_vm7, %v1995_v36, %v2001_v48  ;;  %v2019_v31 = vsel %vm2018_vm14, %v2017_v52, %v1991_v51 }
 0x7be   :  { %v2007_v49 = vpop.permute.xlu1 %2006 }
 0x7bf   :  { %v2021_v53 = vsel %vm2016_vm13, %v2020_v29, %v2007_v49 }
 0x7c2   :  { %v2013_v30 = vpop.permute.xlu1 %2012 }
 0x7c3   :  { %v2022_v54 = vsel %vm2018_vm14, %v2021_v53, %v2013_v30 }
 0x7c4   :  { %v2025_v55 = vcombine.low %v2019_v31, %v2022_v54 }
 0x7c6   :  { %2081 = vst.sshfl [vmem:[#allocation8] sm:$0x33 pattern:$0x76325410] %v2025_v55 }
 0x7c7   :  { %2423 = shalt.err (!%p2420_p5)
}
 0x7c8   :  { %2044 = dma.vmem_to_hbm [thread:$0]  %s2042_s13, 64, %s2825_s4, [#allocation4]  }
 0x7c9   :  { %2436 = dma.done.wait [#allocation4], 64  }
 0x7ca   :  { %2437 = vsyncadd [#allocation4], 4294967232 }
 0x7cb   :  { %2048 = vsyncpa [#allocation3], 1 }
 0x7cc   :  { %2049 = vsyncpa [#allocation6], 1 }
 0x7cd   :  { %2050 = vsyncpa [#allocation4], 1 }

</bundles_post_ra>
